<compile_context>
chip_gen: v6e
topology: v6e:2x2x1
jax: 0.10.0
libtpu: 0.0.40
codegen_flags: <defaults>
</compile_context>

<pallas_src>
import jax
import jax.numpy as jnp
from jax.experimental import pallas as pl
from jax.experimental.pallas import tpu as pltpu

_LANE = 128
_TILE_BYTES = 4 * 1024 * 1024          # ~4 MiB per tile buffer (per review, v7x-friendly)
_VMEM_LIMIT = 48 * 1024 * 1024         # safe on v5e/v6e (<=128 MiB) and v7x (<=64 MiB)


# ------------------------------- Pallas kernel --------------------------------
def _permute_021_kernel(x_ref, o_ref):
    """x_ref: (tc, tt)  ->  o_ref: (tt, tc); pure in-VMEM (XLU) transpose."""
    o_ref[...] = x_ref[...].T


# ------------------------------ tiling helpers ---------------------------------
def _round_up(n, m):
    return ((n + m - 1) // m) * m


def _largest_tile(dim, cap):
    """Largest multiple of 128 that divides `dim` (itself a 128-multiple) and is <= cap."""
    cap = max(_LANE, min(cap, dim))
    for k in range(cap // _LANE, 0, -1):
        t = k * _LANE
        if dim % t == 0:
            return t
    return _LANE


def _select_tiles(cp, tp, itemsize, batch):
    # dtype-scaled per-tile element budget (constant bytes-per-step across dtypes)
    budget_elems = max(_LANE * _LANE, _TILE_BYTES // itemsize)
    # Prioritize a wide C tile: C is the output lane axis -> contiguous unmasked stores.
    tc = _largest_tile(cp, budget_elems // _LANE)
    tt = _largest_tile(tp, budget_elems // tc)
    # v7x megacore: guarantee >= 2 parallel blocks when batch == 1.
    if batch * (cp // tc) * (tp // tt) < 2:
        if tt >= 2 * _LANE:
            tt //= 2
        elif tc >= 2 * _LANE:
            tc //= 2
    return tc, tt


# --------------------------------- wrapper --------------------------------------
def pallas_permute_021(x):
    """x: (B, C, T) -> (B, T, C), equivalent to torch x.permute(0, 2, 1)."""
    B, C, T = x.shape
    Cp, Tp = _round_up(C, _LANE), _round_up(T, _LANE)

    # Pad ragged / narrow dims to 128-multiples so every block (in and out)
    # is lane-dense and bounded; cheap one-time HBM pass, no-op on aligned dims.
    if Cp != C or Tp != T:
        x = jnp.pad(x, ((0, 0), (0, Cp - C), (0, Tp - T)))

    tc, tt = _select_tiles(Cp, Tp, jnp.dtype(x.dtype).itemsize, B)
    grid = (B, Cp // tc, Tp // tt)

    out = pl.pallas_call(
        _permute_021_kernel,
        out_shape=jax.ShapeDtypeStruct((B, Tp, Cp), x.dtype),
        grid=grid,
        in_specs=[
            # input tile: rows = channels, cols = time
            pl.BlockSpec((pl.Squeezed(), tc, tt), lambda b, ci, tj: (b, ci, tj)),
        ],
        # output tile: rows = time, cols = channels (block indices swapped)
        out_specs=pl.BlockSpec((pl.Squeezed(), tt, tc), lambda b, ci, tj: (b, tj, ci)),
        compiler_params=pltpu.CompilerParams(
            dimension_semantics=("parallel", "parallel", "parallel"),
            vmem_limit_bytes=_VMEM_LIMIT,
        ),
    )(x)

    if Cp != C or Tp != T:
        out = out[:, :T, :C]
    return out


# ------------------------------------ main -------------------------------------
if __name__ == "__main__":
    key = jax.random.PRNGKey(0)
    k1, k2 = jax.random.split(key)

    # Primary case: lane-dense, 128-multiple dims -> no padding, single kernel.
    x = jax.random.normal(k1, (2, 128, 256), jnp.float32)   # (batch, channels, time)
    fwd = jax.jit(pallas_permute_021)
    out = jax.block_until_ready(fwd(x))
    assert out.shape == (2, 256, 128), out.shape
    assert bool(jnp.array_equal(out, jnp.transpose(x, (0, 2, 1))))

    # Ragged / narrow-C case: padded to 128-multiples inside the wrapper,
    # sliced back after -> lane-dense blocks, bounded VMEM, still one kernel.
    y = jax.random.normal(k2, (2, 32, 300), jnp.float32)
    out2 = jax.block_until_ready(jax.jit(pallas_permute_021)(y))
    assert out2.shape == (2, 300, 32), out2.shape
    assert bool(jnp.array_equal(out2, jnp.transpose(y, (0, 2, 1))))

    print("KERNEL_OK")
</pallas_src>

<mosaic_0001>
module attributes {stable_mosaic.version = 11 : i64} {
  func.func @_permute_021_kernel(%arg0: i32, %arg1: i32, %arg2: i32, %arg3: memref<1x128x256xf32, #tpu.memory_space<vmem>>, %arg4: memref<1x256x128xf32, #tpu.memory_space<vmem>>) attributes {dimension_semantics = [#tpu.dimension_semantics<parallel>, #tpu.dimension_semantics<parallel>, #tpu.dimension_semantics<parallel>], iteration_bounds = array<i64: 2, 1, 1>, scalar_prefetch = 0 : i64, scratch_operands = 0 : i64, tpu.core_type = #tpu.core_type<tc>, window_params = [{transform_indices = @transform_0, window_bounds = array<i64: 1, 128, 256>}, {transform_indices = @transform_1, window_bounds = array<i64: 1, 256, 128>}]} {
    %c0 = arith.constant 0 : index
    %c0_0 = arith.constant 0 : index
    %c0_1 = arith.constant 0 : index
    %0 = vector.load %arg3[%c0, %c0_0, %c0_1] : memref<1x128x256xf32, #tpu.memory_space<vmem>>, vector<1x128x256xf32>
    %1 = vector.shape_cast %0 : vector<1x128x256xf32> to vector<128x256xf32>
    %2 = tpu.transpose %1, [1, 0] : vector<128x256xf32> -> vector<256x128xf32>
    %c0_2 = arith.constant 0 : index
    %c0_3 = arith.constant 0 : index
    %c0_4 = arith.constant 0 : index
    %3 = vector.load %arg4[%c0_2, %c0_3, %c0_4] : memref<1x256x128xf32, #tpu.memory_space<vmem>>, vector<1x256x128xf32>
    %4 = vector.shape_cast %3 : vector<1x256x128xf32> to vector<256x128xf32>
    %5 = vector.shape_cast %2 : vector<256x128xf32> to vector<1x256x128xf32>
    tpu.vector_store %arg4[%c0_2, %c0_3, %c0_4], %5 {strides = array<i32>} : memref<1x256x128xf32, #tpu.memory_space<vmem>>, vector<1x256x128xf32>,
    return
  }
  func.func @transform_0(%arg0: i32, %arg1: i32, %arg2: i32) -> (i32, i32, i32) {
    %c0_i32 = arith.constant 0 : i32
    return %arg0, %arg1, %arg2 : i32, i32, i32
  }
  func.func @transform_1(%arg0: i32, %arg1: i32, %arg2: i32) -> (i32, i32, i32) {
    %c0_i32 = arith.constant 0 : i32
    return %arg0, %arg2, %arg1 : i32, i32, i32
  }
}

</mosaic_0001>

<bundles_post_ra>
// kernel: pallas_permute_021.1
= control target key start
LH: loop header
LB: loop body
LE: loop exit
PB: predicated region body
PF: predicated region fallthrough
CT: control target
= control target key end

     0   :  { %6 = vsyncpa [#allocation3], 0  ;;  %s836_s0 = inlined_call_operand.hbm [shape: f32[2,128,256], index: 0, kind: input, shape index: {}]   ;;  %s837_s1 = inlined_call_operand.hbm [shape: f32[2,256,128], index: 1, kind: output, shape index: {}]  }
   0x1   :  { %8 = vsyncpa [#allocation3 + $0x1], 0 }
   0x2   :  { %9 = vsyncpa [#allocation4], 0 }
   0x3   :  { %11 = vsyncpa [#allocation4 + $0x1], 0  ;;  %s617_s6 = smov 0   ;;  %s619_s7 = smov 0  }
   0x4   :  { %s621_s8 = smov 0   ;;  %s623_s9 = smov 0  }
   0x5   :  { %s625_s10 = smov 0   ;;  %s627_s11 = smov 0  }
   0x6 LB: > { %s408_s12 = sadd.s32 4294967295, %s599_s11   ;;  %s409_s13 = sadd.s32 4294967294, %s599_s11   ;;  %s599_s11 = sphi %s627_s11, %s17_s11   ;;  %s595_s10 = sphi %s625_s10, %s848_s10   ;;  %s591_s9 = sphi %s623_s9, %s847_s9   ;;  %s587_s8 = sphi %s621_s8, %s846_s8   ;;  %s583_s7 = sphi %s619_s7, %s845_s7   ;;  %s579_s6 = sphi %s617_s6, %s844_s6  }
   0x7   : > { %s36_s14 = sadd.s32 1, %s595_s10  ;;  %s47_s15 = sadd.s32 1, %s587_s8 }
   0x8   : > { %p38_p0 = scmp.ge.s32.totalorder %s36_s14, 2  ;;  %p54_p1 = scmp.ne.s32.totalorder %s587_s8, %s583_s7 }
   0x9   : > { %p55_p2 = scmp.eq.s32.totalorder %s599_s11, 0  ;;  %p60_p3 = scmp.ne.s32.totalorder %s583_s7, %s579_s6 }
   0xa   : > { %s850_s14 = smov (%p38_p0, %s36_s14), 0  ;;  %p61_p5 = scmp.eq.s32.totalorder %s408_s12, 0 }
   0xb   : > { %p658_p4 = por %p55_p2, %p54_p1  ;;  %s40_s17 = ssub.s32 %s595_s10, %s850_s14 }
   0xc   : > { %p88_p6 = scmp.eq.s32.totalorder %s408_s12, 1  ;;  %p45_p7 = scmp.eq.s32.totalorder %s40_s17, 0 }
   0xd   : > { %p664_p8 = por %p61_p5, %p60_p3  ;;  %p94_p10 = scmp.eq.s32.totalorder %s409_s13, 1 }
   0xe   : > { %p668_p9 = por %p88_p6, %p54_p1  ;;  %p437_p13 = scmp.lt.s32.totalorder %s599_s11, 2 }
   0xf   : > { %s673_s20 = scalar_select %p45_p7, %s587_s8, %s47_s15  }
  0x10   : > { %p675_p11 = por %p94_p10, %p60_p3  ;;  %s114_s22 = sand.u32 1, %s587_s8  }
  0x11   : > { %s412_s23 = sshll.u32 %s114_s22, 8  ;;  %s423_s24 = sshll.u32 %s595_s10, 12 }
  0x12   : > { %s129_s27 = scalar_lea.hbm %s836_s0, %s423_s24  ;;  %s118_s28 = scalar_lea.vmem [#allocation2], %s412_s23 }
  0x13   : > { %s130_s29 = sshll.u32 %s118_s28, 4  ;;  %p688_p0 = pnand %p437_p13, %p658_p4  ;;  %s131_s29 = int_to_ptr.vmem [resolvable:$true] %s130_s29 }
  0x14   : > { %p415_p1 = scmp.ge.s32.totalorder %s599_s11, 1  ;;  %s115_s2 = scalar_lea.sflag [#allocation3], %s114_s22 }
  0x15   : > { %p493_p2 = pneg %p688_p0  ;;  %s504_s3 = scalar_lea.vmem %s131_s29, 4096 }
  0x16   : > { %p505_p3 = scmp.ne.s32.totalorder %s131_s29, %s504_s3  ;;  %s601_s4 = smov [#allocation2]  }
  0x17   : > { %s509_s5 = sshll.u32 %s601_s4, 4  ;;  %s510_s5 = int_to_ptr.vmem [resolvable:$false] %s509_s5 }
  0x18   : > { %p507_p5 = pnand %p505_p3, %p493_p2  ;;  %s511_s12 = scalar_lea.vmem %s510_s5, 8192 }
  0x19   : > { %p512_p7 = scmp.lt.s32.totalorder %s131_s29, %s510_s5  ;;  %p513_p10 = scmp.lt.s32.totalorder %s511_s12, %s504_s3 }
  0x1a   : > { %p508_p6 = pneg %p507_p5 }
  0x1b   : > { %p514_p12 = por %p513_p10, %p512_p7 }
  0x1d   : > { %p515_p4 = pnand %p514_p12, %p508_p6 }
  0x1f   : > { %518 = shalt.err (!%p515_p4)
}
  0x20   : > { %s602_s13 = smov 256   ;;  %s603_s15 = smov 16  }
  0x21   : > { %432 = dma.hbm_to_vmem [thread:$0]  (!%p688_p0), %s129_s27, 4096, %s131_s29, %s115_s2, %s602_s13, %s602_s13, %s603_s15  }
  0x22   : > { %p138_p13 = scmp.lt.s32.totalorder %s599_s11, 3 }
  0x24   : > { %p139_p2 = pnand %p415_p1, %p138_p13 }
  0x25   : > { %s701_s16 = sand.u32 (!%p139_p2), 1, %s583_s7  }
  0x26   : > { %142 = sbr.rel (%p139_p2) target bundleno = 244 (0xf4), region = 24  ;;  %s416_s17 = sshll.u32 (!%p139_p2), %s701_s16, 8 }
  0x27   : > { %s145_s22 = scalar_lea.sflag (!%p139_p2), [#allocation3], %s701_s16  ;;  %s707_s23 = scalar_lea.vmem (!%p139_p2), [#allocation2], %s416_s17 }
  0x2b   : > { %570 = dma.done.wait (%p664_p8), %s145_s22, 4096  }
  0x2c   : > { %572 = vsyncadd (%p664_p8), %s145_s22, 4294963200  ;;  %v171_v0 = vld [vmem:[%s707_s23 + $0x8] sm:$0xff]  ;;  %v170_v1 = vld [vmem:[%s707_s23] sm:$0xff]  ;;  %s747_s18 = scalar_lea.vmem [#allocation5], %s416_s17  ;;  %s424_s24 = sshll.u32 %s591_s9, 12 }
  0x2d   : > { %234 = vxpose.xlu1.b32.start [1/16] %v171_v0, 128  ;;  %202 = vxpose.xlu0.b32.start [1/16] %v170_v1, 128  ;;  %v173_v2 = vld [vmem:[%s707_s23 + $0x18] sm:$0xff]  ;;  %v172_v3 = vld [vmem:[%s707_s23 + $0x10] sm:$0xff]  ;;  %v175_v4 = vld [vmem:[%s707_s23 + $0x28] sm:$0xff]  ;;  %s315_s25 = sshll.u32 %s747_s18, 4  ;;  %s784_s28 = scalar_lea.hbm %s837_s1, %s424_s24  ;;  %s786_s25 = int_to_ptr.vmem [resolvable:$true] %s315_s25 }
  0x2e   : > { %v174_v5 = vld [vmem:[%s707_s23 + $0x20] sm:$0xff]  ;;  %v177_v6 = vld [vmem:[%s707_s23 + $0x38] sm:$0xff]  ;;  %v176_v7 = vld [vmem:[%s707_s23 + $0x30] sm:$0xff]  ;;  %s299_s9 = scalar_lea.sflag [#allocation4], %s701_s16  ;;  %s519_s29 = scalar_lea.vmem %s786_s25, 4096 }
  0x2f   : > { %v179_v8 = vld [vmem:[%s707_s23 + $0x48] sm:$0xff]  ;;  %v178_v9 = vld [vmem:[%s707_s23 + $0x40] sm:$0xff]  ;;  %v181_v10 = vld [vmem:[%s707_s23 + $0x58] sm:$0xff]  ;;  %p520_p8 = scmp.ne.s32.totalorder %s786_s25, %s519_s29  ;;  %s604_s30 = smov [#allocation5]  }
  0x30   : > { %v180_v11 = vld [vmem:[%s707_s23 + $0x50] sm:$0xff]  ;;  %v183_v12 = vld [vmem:[%s707_s23 + $0x68] sm:$0xff]  ;;  %v182_v13 = vld [vmem:[%s707_s23 + $0x60] sm:$0xff]  ;;  %s523_s2 = sshll.u32 %s604_s30, 4  ;;  %s524_s2 = int_to_ptr.vmem [resolvable:$false] %s523_s2 }
  0x31   : > { %235 = vxpose.xlu1.b32.cont [2/16] %v173_v2, 128  ;;  %203 = vxpose.xlu0.b32.cont [2/16] %v172_v3, 128  ;;  %v185_v14 = vld [vmem:[%s707_s23 + $0x78] sm:$0xff]  ;;  %v184_v15 = vld [vmem:[%s707_s23 + $0x70] sm:$0xff]  ;;  %v187_v16 = vld [vmem:[%s707_s23 + $0x88] sm:$0xff]  ;;  %p521_p12 = pnand %p520_p8, %p668_p9  ;;  %s525_s3 = scalar_lea.vmem %s524_s2, 8192 }
  0x32   : > { %v186_v17 = vld [vmem:[%s707_s23 + $0x80] sm:$0xff]  ;;  %v189_v18 = vld [vmem:[%s707_s23 + $0x98] sm:$0xff]  ;;  %v188_v19 = vld [vmem:[%s707_s23 + $0x90] sm:$0xff]  ;;  %p526_p1 = scmp.lt.s32.totalorder %s786_s25, %s524_s2  ;;  %p527_p3 = scmp.lt.s32.totalorder %s525_s3, %s519_s29 }
  0x33   : > { %v191_v20 = vld [vmem:[%s707_s23 + $0xa8] sm:$0xff]  ;;  %v190_v21 = vld [vmem:[%s707_s23 + $0xa0] sm:$0xff]  ;;  %v193_v22 = vld [vmem:[%s707_s23 + $0xb8] sm:$0xff]  ;;  %p522_p0 = pneg %p521_p12 }
  0x34   : > { %v192_v23 = vld [vmem:[%s707_s23 + $0xb0] sm:$0xff]  ;;  %v195_v24 = vld [vmem:[%s707_s23 + $0xc8] sm:$0xff]  ;;  %v194_v25 = vld [vmem:[%s707_s23 + $0xc0] sm:$0xff]  ;;  %p528_p5 = por %p527_p3, %p526_p1 }
  0x35   : > { %236 = vxpose.xlu1.b32.cont [3/16] %v175_v4, 128  ;;  %204 = vxpose.xlu0.b32.cont [3/16] %v174_v5, 128  ;;  %v197_v26 = vld [vmem:[%s707_s23 + $0xd8] sm:$0xff]  ;;  %v196_v27 = vld [vmem:[%s707_s23 + $0xd0] sm:$0xff]  ;;  %v199_v28 = vld [vmem:[%s707_s23 + $0xe8] sm:$0xff] }
  0x36   : > { %v198_v29 = vld [vmem:[%s707_s23 + $0xe0] sm:$0xff]  ;;  %v201_v30 = vld [vmem:[%s707_s23 + $0xf8] sm:$0xff]  ;;  %v200_v31 = vld [vmem:[%s707_s23 + $0xf0] sm:$0xff]  ;;  %p529_p6 = pnand %p528_p5, %p522_p0 }
  0x39   : > { %237 = vxpose.xlu1.b32.cont [4/16] %v177_v6, 128  ;;  %205 = vxpose.xlu0.b32.cont [4/16] %v176_v7, 128 }
  0x3d   : > { %238 = vxpose.xlu1.b32.cont [5/16] %v179_v8, 128  ;;  %206 = vxpose.xlu0.b32.cont [5/16] %v178_v9, 128 }
  0x41   : > { %239 = vxpose.xlu1.b32.cont [6/16] %v181_v10, 128  ;;  %207 = vxpose.xlu0.b32.cont [6/16] %v180_v11, 128 }
  0x45   : > { %240 = vxpose.xlu1.b32.cont [7/16] %v183_v12, 128  ;;  %208 = vxpose.xlu0.b32.cont [7/16] %v182_v13, 128 }
  0x49   : > { %241 = vxpose.xlu1.b32.cont [8/16] %v185_v14, 128  ;;  %209 = vxpose.xlu0.b32.cont [8/16] %v184_v15, 128 }
  0x4d   : > { %242 = vxpose.xlu1.b32.cont [9/16] %v187_v16, 128  ;;  %210 = vxpose.xlu0.b32.cont [9/16] %v186_v17, 128 }
  0x51   : > { %243 = vxpose.xlu1.b32.cont [10/16] %v189_v18, 128  ;;  %211 = vxpose.xlu0.b32.cont [10/16] %v188_v19, 128 }
  0x55   : > { %244 = vxpose.xlu1.b32.cont [11/16] %v191_v20, 128  ;;  %212 = vxpose.xlu0.b32.cont [11/16] %v190_v21, 128 }
  0x59   : > { %245 = vxpose.xlu1.b32.cont [12/16] %v193_v22, 128  ;;  %213 = vxpose.xlu0.b32.cont [12/16] %v192_v23, 128 }
  0x5d   : > { %246 = vxpose.xlu1.b32.cont [13/16] %v195_v24, 128  ;;  %214 = vxpose.xlu0.b32.cont [13/16] %v194_v25, 128 }
  0x61   : > { %247 = vxpose.xlu1.b32.cont [14/16] %v197_v26, 128  ;;  %215 = vxpose.xlu0.b32.cont [14/16] %v196_v27, 128 }
  0x65   : > { %248 = vxpose.xlu1.b32.cont [15/16] %v199_v28, 128  ;;  %216 = vxpose.xlu0.b32.cont [15/16] %v198_v29, 128 }
  0x69   : > { %249 = vxpose.xlu1.b32.end [16/16] %v201_v30, 128  ;;  %217 = vxpose.xlu0.b32.end [16/16] %v200_v31, 128 }
  0xa9   : > { %v250_v32 = vpop.trf.xlu1  ;;  %v218_v33 = vpop.trf.xlu0 }
  0xaa   : > { %282 = vst [vmem:[%s747_s18 + $0x80] sm:$0xff] %v250_v32  ;;  %266 = vst [vmem:[%s747_s18] sm:$0xff] %v218_v33 }
  0xad   : > { %v251_v34 = vpop.trf.xlu1  ;;  %v219_v35 = vpop.trf.xlu0 }
  0xae   : > { %283 = vst [vmem:[%s747_s18 + $0x88] sm:$0xff] %v251_v34  ;;  %267 = vst [vmem:[%s747_s18 + $0x8] sm:$0xff] %v219_v35 }
  0xb1   : > { %v252_v36 = vpop.trf.xlu1  ;;  %v220_v37 = vpop.trf.xlu0 }
  0xb2   : > { %284 = vst [vmem:[%s747_s18 + $0x90] sm:$0xff] %v252_v36  ;;  %268 = vst [vmem:[%s747_s18 + $0x10] sm:$0xff] %v220_v37 }
  0xb5   : > { %v253_v38 = vpop.trf.xlu1  ;;  %v221_v39 = vpop.trf.xlu0 }
  0xb6   : > { %285 = vst [vmem:[%s747_s18 + $0x98] sm:$0xff] %v253_v38  ;;  %269 = vst [vmem:[%s747_s18 + $0x18] sm:$0xff] %v221_v39 }
  0xb9   : > { %v254_v40 = vpop.trf.xlu1  ;;  %v222_v41 = vpop.trf.xlu0 }
  0xba   : > { %286 = vst [vmem:[%s747_s18 + $0xa0] sm:$0xff] %v254_v40  ;;  %270 = vst [vmem:[%s747_s18 + $0x20] sm:$0xff] %v222_v41 }
  0xbd   : > { %v255_v42 = vpop.trf.xlu1  ;;  %v223_v43 = vpop.trf.xlu0 }
  0xbe   : > { %287 = vst [vmem:[%s747_s18 + $0xa8] sm:$0xff] %v255_v42  ;;  %271 = vst [vmem:[%s747_s18 + $0x28] sm:$0xff] %v223_v43 }
  0xc1   : > { %v256_v44 = vpop.trf.xlu1  ;;  %v224_v45 = vpop.trf.xlu0 }
  0xc2   : > { %288 = vst [vmem:[%s747_s18 + $0xb0] sm:$0xff] %v256_v44  ;;  %272 = vst [vmem:[%s747_s18 + $0x30] sm:$0xff] %v224_v45 }
  0xc5   : > { %v257_v46 = vpop.trf.xlu1  ;;  %v225_v47 = vpop.trf.xlu0 }
  0xc6   : > { %289 = vst [vmem:[%s747_s18 + $0xb8] sm:$0xff] %v257_v46  ;;  %273 = vst [vmem:[%s747_s18 + $0x38] sm:$0xff] %v225_v47 }
  0xc9   : > { %v258_v48 = vpop.trf.xlu1  ;;  %v226_v49 = vpop.trf.xlu0 }
  0xca   : > { %290 = vst [vmem:[%s747_s18 + $0xc0] sm:$0xff] %v258_v48  ;;  %274 = vst [vmem:[%s747_s18 + $0x40] sm:$0xff] %v226_v49 }
  0xcd   : > { %v259_v50 = vpop.trf.xlu1  ;;  %v227_v51 = vpop.trf.xlu0 }
  0xce   : > { %291 = vst [vmem:[%s747_s18 + $0xc8] sm:$0xff] %v259_v50  ;;  %275 = vst [vmem:[%s747_s18 + $0x48] sm:$0xff] %v227_v51 }
  0xd1   : > { %v260_v52 = vpop.trf.xlu1  ;;  %v228_v53 = vpop.trf.xlu0 }
  0xd2   : > { %292 = vst [vmem:[%s747_s18 + $0xd0] sm:$0xff] %v260_v52  ;;  %276 = vst [vmem:[%s747_s18 + $0x50] sm:$0xff] %v228_v53 }
  0xd5   : > { %v261_v54 = vpop.trf.xlu1  ;;  %v229_v55 = vpop.trf.xlu0 }
  0xd6   : > { %293 = vst [vmem:[%s747_s18 + $0xd8] sm:$0xff] %v261_v54  ;;  %277 = vst [vmem:[%s747_s18 + $0x58] sm:$0xff] %v229_v55 }
  0xd9   : > { %v262_v56 = vpop.trf.xlu1  ;;  %v230_v57 = vpop.trf.xlu0 }
  0xda   : > { %294 = vst [vmem:[%s747_s18 + $0xe0] sm:$0xff] %v262_v56  ;;  %278 = vst [vmem:[%s747_s18 + $0x60] sm:$0xff] %v230_v57 }
  0xdd   : > { %v263_v58 = vpop.trf.xlu1  ;;  %v231_v59 = vpop.trf.xlu0 }
  0xde   : > { %295 = vst [vmem:[%s747_s18 + $0xe8] sm:$0xff] %v263_v58  ;;  %279 = vst [vmem:[%s747_s18 + $0x68] sm:$0xff] %v231_v59 }
  0xe1   : > { %v264_v60 = vpop.trf.xlu1  ;;  %v232_v61 = vpop.trf.xlu0 }
  0xe2   : > { %296 = vst [vmem:[%s747_s18 + $0xf0] sm:$0xff] %v264_v60  ;;  %280 = vst [vmem:[%s747_s18 + $0x70] sm:$0xff] %v232_v61 }
  0xe5   : > { %v265_v62 = vpop.trf.xlu1  ;;  %v233_v63 = vpop.trf.xlu0 }
  0xe6   : > { %297 = vst [vmem:[%s747_s18 + $0xf8] sm:$0xff] %v265_v62  ;;  %281 = vst [vmem:[%s747_s18 + $0x78] sm:$0xff] %v233_v63 }
  0xe7   : > { %532 = shalt.err (!%p529_p6)
}
  0xe8   : > { %s533_s4 = scalar_lea.hbm %s784_s28, 4096  ;;  %s537_s13 = scalar_lea.hbm %s837_s1, 8192 }
  0xe9   : > { %p534_p7 = scmp.ne.s32.totalorder %s784_s28, %s533_s4  ;;  %p538_p13 = scmp.lt.s32.totalorder %s784_s28, %s837_s1 }
  0xea   : > { %p539_p2 = scmp.lt.s32.totalorder %s537_s13, %s533_s4 }
  0xeb   : > { %p535_p10 = pnand %p534_p7, %p668_p9 }
  0xec   : > { %p540_p8 = por %p539_p2, %p538_p13 }
  0xed   : > { %p536_p4 = pneg %p535_p10 }
  0xef   : > { %p541_p12 = pnand %p540_p8, %p536_p4 }
  0xf1   : > { %544 = shalt.err (!%p541_p12)
}
  0xf2   : > { %s605_s22 = smov 128   ;;  %s606_s23 = smov 8  }
  0xf3   : > { %427 = dma.vmem_to_hbm [thread:$0]  (%p668_p9), %s786_s25, 4096, %s784_s28, %s299_s9, %s605_s22, %s605_s22, %s606_s23  }
  0xf4 PF: > { %s330_s18 = sand.u32 1, %s579_s6   ;;  %p843_p0 = scmp.ge.s32.totalorder %s599_s11, 2 }
  0xf5   : > { %s331_s24 = scalar_lea.sflag [#allocation4], %s330_s18 }
  0xf6   : > { %p434_p1 = pnand %p843_p0, %p675_p11 }
  0xf8   : > { %p435_p3 = pneg %p434_p1 }
  0xfa   : > { %574 = dma.done.wait (%p435_p3), %s331_s24, 4096  }
  0xfb   : > { %576 = vsyncadd (%p435_p3), %s331_s24, 4294963200  ;;  %s17_s11 = sadd.s32 1, %s599_s11   ;;  %s844_s6 = smov %s583_s7 }
  0xfc   : > { %p14_p5 = scmp.ge.s32.totalorder %s17_s11, 4   ;;  %s845_s7 = smov %s587_s8 }
  0xfd   : > { %s846_s8 = smov %s673_s20  ;;  %s847_s9 = smov %s595_s10 }
  0xfe   : > { %s848_s10 = smov %s850_s14  ;;  %16 = sbr.rel (!%p14_p5) target bundleno = 6 (0x6), region = 69 }
 0x103   :  { %336 = vsyncpa [#allocation3], 1 }
 0x104   :  { %338 = vsyncpa [#allocation3 + $0x1], 1 }
 0x105   :  { %339 = vsyncpa [#allocation4], 1 }
 0x106   :  { %341 = vsyncpa [#allocation4 + $0x1], 1 }

</bundles_post_ra>
